<compile_context>
chip_gen: v5e
topology: v5e:2x2
jax: 0.10.0
libtpu: 0.0.40
codegen_flags: <defaults>
</compile_context>

<pallas_src>
import functools

import jax
import jax.numpy as jnp
from jax import lax
from jax.experimental import pallas as pl
from jax.experimental.pallas import tpu as pltpu


# ---------------------------------------------------------------------------
# Kernel
# ---------------------------------------------------------------------------
def qtran_qbase2_kernel(acts_ref, st_ref,
                        wa1b_ref, ba1_ref, wa2_ref, ba2_ref,
                        wq1s_ref, wq1a_ref, bq1_ref,
                        wq2_ref, bq2_ref, wq3_ref, bq3_ref,
                        out_ref, *, n_agents, n_actions, chunk):
    # VMEM-resident weights; hoisted out of the lane-chunk loop so the unrolled
    # body does not re-load or re-broadcast them.
    wa1b = wa1b_ref[...]             # (A*n_act, A*n_act) block-diag, act dtype
    ba1 = ba1_ref[...]               # (A*n_act, 1) f32 (per-agent bias tiled)
    wa2 = wa2_ref[...]               # (n_act, n_act) f32
    ba2s = n_agents * ba2_ref[...]   # (n_act, 1) f32, pre-scaled by n_agents
    wq1s = wq1s_ref[...]             # (H, S) act dtype
    wq1a = wq1a_ref[...]             # (H, n_act) f32
    bq1 = bq1_ref[...]               # (H, 1) f32
    wq2 = wq2_ref[...]               # (H, H) f32
    bq2 = bq2_ref[...]               # (H, 1) f32
    wq3 = wq3_ref[...]               # (1, H) f32
    bq3 = bq3_ref[...]               # (1, 1) f32

    tb = out_ref.shape[1]
    n_chunks = tb // chunk
    alpha = 1e-05

    def body(c, carry):
        start = pl.multiple_of(c * chunk, 128)
        acts = acts_ref[:, pl.ds(start, chunk)]   # (A*n_act, chunk) act dtype
        st = st_ref[:, pl.ds(start, chunk)]       # (S, chunk)       act dtype

        # -- action encoder layer 1 for all agents: one block-diagonal dot --
        h = jnp.dot(wa1b, acts, preferred_element_type=jnp.float32) + ba1
        h = jnp.maximum(h, 0.0)                   # (A*n_act, chunk) f32

        # -- sum over agents (VPU adds on static row groups) --
        acc = h[0:n_actions, :]
        for a in range(1, n_agents):
            acc = acc + h[a * n_actions:(a + 1) * n_actions, :]

        # -- encoder layer 2 applied AFTER the agent sum (bias scaled by A) --
        enc = jnp.dot(wa2, acc, preferred_element_type=jnp.float32) + ba2s

        # -- q MLP; concat([state, enc]) @ Wq1 split into two matmuls --
        h1 = (jnp.dot(wq1s, st, preferred_element_type=jnp.float32)
              + jnp.dot(wq1a, enc, preferred_element_type=jnp.float32)
              + bq1)
        h1 = jnp.maximum(h1, 0.0)                 # (H, chunk)
        h2 = jnp.maximum(
            jnp.dot(wq2, h1, preferred_element_type=jnp.float32) + bq2, 0.0)
        q = jnp.dot(wq3, h2, preferred_element_type=jnp.float32) + bq3

        # ELU(alpha=1e-05) then negate (module does q = -self.q(inputs))
        q = jnp.where(q > 0.0, q, alpha * (jnp.exp(q) - 1.0))
        out_ref[:, pl.ds(start, chunk)] = -q      # (1, chunk), lane-dense
        return carry

    lax.fori_loop(0, n_chunks, body, 0, unroll=True)


# ---------------------------------------------------------------------------
# Wrapper
# ---------------------------------------------------------------------------
def _round_up(x, m):
    return ((x + m - 1) // m) * m


def _pick_chunk(tb, chunk_max=512):
    """Largest multiple of 128 that divides tb and is <= chunk_max."""
    c = min(chunk_max, tb)
    c = (c // 128) * 128
    while tb % c:
        c -= 128
    return c


@functools.partial(jax.jit, static_argnames=("tb_max", "act_dtype"))
def qtran_qbase2_forward(state, actions, params, *, tb_max=2048,
                         act_dtype=jnp.bfloat16):
    """state: (E, T, state_shape) f32; actions: (E, T, A, n_actions) f32.

    Returns q of shape (E*T, 1), matching the PyTorch module.
    """
    E, T, A, n_act = actions.shape
    B = E * T
    S = state.shape[-1]
    LANE = 128

    # Batch tiling: one big lane-dense tile when it fits (amortize the fixed
    # per-grid-step cost); otherwise an even number of balanced tiles so v7x's
    # two TensorCores split the "parallel" grid evenly.
    n_tiles = max(1, -(-B // tb_max))
    if n_tiles > 1 and n_tiles % 2:
        n_tiles += 1
    TB = _round_up(-(-B // n_tiles), LANE)
    B_pad = TB * n_tiles
    chunk = _pick_chunk(TB)

    # Activation streams in bf16 (halves HBM traffic + transpose cost); the
    # cast, the single feature-major transpose (batch -> lanes) and the pad are
    # all fused under this jit.
    acts_fm = actions.astype(act_dtype).reshape(B, A * n_act).T   # (A*n_act, B)
    st_fm = state.astype(act_dtype).reshape(B, S).T               # (S, B)
    if B_pad != B:
        acts_fm = jnp.pad(acts_fm, ((0, 0), (0, B_pad - B)))
        st_fm = jnp.pad(st_fm, ((0, 0), (0, B_pad - B)))

    # Fuse the A per-agent first-layer dots into one block-diagonal weight.
    wa1b = jnp.kron(jnp.eye(A, dtype=params["wa1"].dtype), params["wa1"])
    ba1t = jnp.tile(params["ba1"], (A, 1))

    weights = (
        wa1b.astype(act_dtype),             # multiplies the bf16 acts stream
        ba1t.astype(jnp.float32),
        params["wa2"].astype(jnp.float32),
        params["ba2"].astype(jnp.float32),
        params["wq1s"].astype(act_dtype),   # multiplies the bf16 state stream
        params["wq1a"].astype(jnp.float32),
        params["bq1"].astype(jnp.float32),
        params["wq2"].astype(jnp.float32),
        params["bq2"].astype(jnp.float32),
        params["wq3"].astype(jnp.float32),
        params["bq3"].astype(jnp.float32),
    )

    def col_spec(rows):
        # batch-tiled operand: block i covers columns [i*TB, (i+1)*TB)
        return pl.BlockSpec((rows, TB), lambda i: (0, i))

    def const_spec(shape):
        # VMEM-resident weight/bias: same (full) block every grid step
        return pl.BlockSpec(shape, lambda i: (0, 0))

    kernel = functools.partial(qtran_qbase2_kernel,
                               n_agents=A, n_actions=n_act, chunk=chunk)

    out = pl.pallas_call(
        kernel,
        out_shape=jax.ShapeDtypeStruct((1, B_pad), jnp.float32),
        grid=(B_pad // TB,),
        in_specs=[col_spec(A * n_act), col_spec(S)]
                 + [const_spec(w.shape) for w in weights],
        out_specs=col_spec(1),
        compiler_params=pltpu.CompilerParams(
            dimension_semantics=("parallel",)),
    )(acts_fm, st_fm, *weights)

    return out[0, :B].reshape(B, 1)


# ---------------------------------------------------------------------------
# Params + pure-JAX reference (mirror of the PyTorch forward)
# ---------------------------------------------------------------------------
def init_params(key, n_actions, state_shape, hidden):
    """Weights stored (out, in) — PyTorch nn.Linear layout — biases (out, 1)."""
    ks = jax.random.split(key, 10)
    scale = 0.1

    def w(k, shape):
        return (scale * jax.random.normal(k, shape)).astype(jnp.float32)

    return {
        # action encoder
        "wa1": w(ks[0], (n_actions, n_actions)),
        "ba1": w(ks[1], (n_actions, 1)),
        "wa2": w(ks[2], (n_actions, n_actions)),
        "ba2": w(ks[3], (n_actions, 1)),
        # q net (first layer weight split: state part + action-encoding part)
        "wq1s": w(ks[4], (hidden, state_shape)),
        "wq1a": w(ks[5], (hidden, n_actions)),
        "bq1": w(ks[6], (hidden, 1)),
        "wq2": w(ks[7], (hidden, hidden)),
        "bq2": w(ks[8], (hidden, 1)),
        "wq3": w(ks[9], (1, hidden)),
        "bq3": jnp.zeros((1, 1), jnp.float32),
    }


def reference_forward(state, actions, p):
    E, T, A, n_act = actions.shape
    B = E * T
    x = actions.reshape(-1, n_act)
    h = jnp.maximum(x @ p["wa1"].T + p["ba1"].T, 0.0)
    enc = h @ p["wa2"].T + p["ba2"].T
    enc = enc.reshape(B, A, n_act).sum(axis=1)
    inputs = jnp.concatenate([state.reshape(B, -1), enc], axis=-1)
    wq1 = jnp.concatenate([p["wq1s"], p["wq1a"]], axis=1)   # (hidden, S+n_act)
    h1 = jnp.maximum(inputs @ wq1.T + p["bq1"].T, 0.0)
    h2 = jnp.maximum(h1 @ p["wq2"].T + p["bq2"].T, 0.0)
    q = h2 @ p["wq3"].T + p["bq3"].T
    alpha = 1e-05
    q = jnp.where(q > 0.0, q, alpha * (jnp.exp(q) - 1.0))
    return -q


# ---------------------------------------------------------------------------
if __name__ == "__main__":
    n_actions, state_shape, hidden = 8, 16, 32
    key = jax.random.PRNGKey(0)
    k_p, k1, k2 = jax.random.split(key, 3)
    params = init_params(k_p, n_actions, state_shape, hidden)

    def make_inputs(k, episode_num, max_episode_len, n_agents):
        ks, ka = jax.random.split(k)
        state = jax.random.normal(
            ks, (episode_num, max_episode_len, state_shape), jnp.float32)
        logits = jax.random.normal(
            ka, (episode_num, max_episode_len, n_agents, n_actions))
        actions = jax.nn.one_hot(jnp.argmax(logits, axis=-1), n_actions,
                                 dtype=jnp.float32)
        return state, actions

    # 1) small shape, f32 activation path: strict parity with the reference
    state, actions = make_inputs(k1, 2, 4, 3)
    q_f32 = qtran_qbase2_forward(state, actions, params,
                                 act_dtype=jnp.float32)
    jax.block_until_ready(q_f32)
    q_ref = reference_forward(state, actions, params)
    assert q_f32.shape == (2 * 4, 1)
    assert jnp.allclose(q_f32, q_ref, atol=1e-4, rtol=1e-4), "f32 mismatch"

    # 2) small shape, default bf16 activation streams (fast path)
    q_bf16 = qtran_qbase2_forward(state, actions, params)
    jax.block_until_ready(q_bf16)
    assert jnp.allclose(q_bf16, q_ref, atol=2e-2, rtol=2e-2), "bf16 mismatch"

    # 3) larger batch forcing a multi-tile (even) grid + chunked inner loop
    state2, actions2 = make_inputs(k2, 4, 300, 3)
    q2 = qtran_qbase2_forward(state2, actions2, params, tb_max=512)
    jax.block_until_ready(q2)
    q2_ref = reference_forward(state2, actions2, params)
    assert q2.shape == (4 * 300, 1)
    assert jnp.allclose(q2, q2_ref, atol=2e-2, rtol=2e-2), "multi-tile mismatch"

    print("KERNEL_OK")
</pallas_src>

<mosaic_0001>
module attributes {stable_mosaic.version = 11 : i64} {
  func.func @qtran_qbase2_kernel(%arg0: i32, %arg1: memref<24x128xf32, #tpu.memory_space<vmem>>, %arg2: memref<16x128xf32, #tpu.memory_space<vmem>>, %arg3: memref<24x24xf32, #tpu.memory_space<vmem>>, %arg4: memref<24x1xf32, #tpu.memory_space<vmem>>, %arg5: memref<8x8xf32, #tpu.memory_space<vmem>>, %arg6: memref<8x1xf32, #tpu.memory_space<vmem>>, %arg7: memref<32x16xf32, #tpu.memory_space<vmem>>, %arg8: memref<32x8xf32, #tpu.memory_space<vmem>>, %arg9: memref<32x1xf32, #tpu.memory_space<vmem>>, %arg10: memref<32x32xf32, #tpu.memory_space<vmem>>, %arg11: memref<32x1xf32, #tpu.memory_space<vmem>>, %arg12: memref<1x32xf32, #tpu.memory_space<vmem>>, %arg13: memref<1x1xf32, #tpu.memory_space<vmem>>, %arg14: memref<1x128xf32, #tpu.memory_space<vmem>>) attributes {dimension_semantics = [#tpu.dimension_semantics<parallel>], iteration_bounds = array<i64: 1>, scalar_prefetch = 0 : i64, scratch_operands = 0 : i64, tpu.core_type = #tpu.core_type<tc>, window_params = [{transform_indices = @transform_0, window_bounds = array<i64: 24, 128>}, {transform_indices = @transform_1, window_bounds = array<i64: 16, 128>}, {pipeline_mode = #tpu.pipeline_mode<synchronous>, transform_indices = @transform_2, window_bounds = array<i64: 24, 24>}, {pipeline_mode = #tpu.pipeline_mode<synchronous>, transform_indices = @transform_3, window_bounds = array<i64: 24, 1>}, {pipeline_mode = #tpu.pipeline_mode<synchronous>, transform_indices = @transform_4, window_bounds = array<i64: 8, 8>}, {pipeline_mode = #tpu.pipeline_mode<synchronous>, transform_indices = @transform_5, window_bounds = array<i64: 8, 1>}, {pipeline_mode = #tpu.pipeline_mode<synchronous>, transform_indices = @transform_6, window_bounds = array<i64: 32, 16>}, {pipeline_mode = #tpu.pipeline_mode<synchronous>, transform_indices = @transform_7, window_bounds = array<i64: 32, 8>}, {pipeline_mode = #tpu.pipeline_mode<synchronous>, transform_indices = @transform_8, window_bounds = array<i64: 32, 1>}, {pipeline_mode = #tpu.pipeline_mode<synchronous>, transform_indices = @transform_9, window_bounds = array<i64: 32, 32>}, {pipeline_mode = #tpu.pipeline_mode<synchronous>, transform_indices = @transform_10, window_bounds = array<i64: 32, 1>}, {pipeline_mode = #tpu.pipeline_mode<synchronous>, transform_indices = @transform_11, window_bounds = array<i64: 1, 32>}, {pipeline_mode = #tpu.pipeline_mode<synchronous>, transform_indices = @transform_12, window_bounds = array<i64: 1, 1>}, {transform_indices = @transform_13, window_bounds = array<i64: 1, 128>}]} {
    %c0 = arith.constant 0 : index
    %c0_0 = arith.constant 0 : index
    %0 = vector.load %arg3[%c0, %c0_0] : memref<24x24xf32, #tpu.memory_space<vmem>>, vector<24x24xf32>
    %c0_1 = arith.constant 0 : index
    %c0_2 = arith.constant 0 : index
    %1 = vector.load %arg4[%c0_1, %c0_2] : memref<24x1xf32, #tpu.memory_space<vmem>>, vector<24x1xf32>
    %c0_3 = arith.constant 0 : index
    %c0_4 = arith.constant 0 : index
    %2 = vector.load %arg5[%c0_3, %c0_4] : memref<8x8xf32, #tpu.memory_space<vmem>>, vector<8x8xf32>
    %c0_5 = arith.constant 0 : index
    %c0_6 = arith.constant 0 : index
    %3 = vector.load %arg6[%c0_5, %c0_6] : memref<8x1xf32, #tpu.memory_space<vmem>>, vector<8x1xf32>
    %cst = arith.constant 3.000000e+00 : f32
    %4 = vector.broadcast %cst : f32 to vector<8x1xf32>
    %5 = arith.mulf %4, %3 : vector<8x1xf32>
    %c0_7 = arith.constant 0 : index
    %c0_8 = arith.constant 0 : index
    %6 = vector.load %arg7[%c0_7, %c0_8] : memref<32x16xf32, #tpu.memory_space<vmem>>, vector<32x16xf32>
    %c0_9 = arith.constant 0 : index
    %c0_10 = arith.constant 0 : index
    %7 = vector.load %arg8[%c0_9, %c0_10] : memref<32x8xf32, #tpu.memory_space<vmem>>, vector<32x8xf32>
    %c0_11 = arith.constant 0 : index
    %c0_12 = arith.constant 0 : index
    %8 = vector.load %arg9[%c0_11, %c0_12] : memref<32x1xf32, #tpu.memory_space<vmem>>, vector<32x1xf32>
    %c0_13 = arith.constant 0 : index
    %c0_14 = arith.constant 0 : index
    %9 = vector.load %arg10[%c0_13, %c0_14] : memref<32x32xf32, #tpu.memory_space<vmem>>, vector<32x32xf32>
    %c0_15 = arith.constant 0 : index
    %c0_16 = arith.constant 0 : index
    %10 = vector.load %arg11[%c0_15, %c0_16] : memref<32x1xf32, #tpu.memory_space<vmem>>, vector<32x1xf32>
    %c0_17 = arith.constant 0 : index
    %c0_18 = arith.constant 0 : index
    %11 = vector.load %arg12[%c0_17, %c0_18] : memref<1x32xf32, #tpu.memory_space<vmem>>, vector<1x32xf32>
    %c0_19 = arith.constant 0 : index
    %c0_20 = arith.constant 0 : index
    %12 = vector.load %arg13[%c0_19, %c0_20] : memref<1x1xf32, #tpu.memory_space<vmem>>, vector<1x1xf32>
    %c0_i32 = arith.constant 0 : i32
    %c128_i32 = arith.constant 128 : i32
    %13 = arith.muli %c0_i32, %c128_i32 : i32
    %14 = tpu.assume_multiple %13, 128 : i32
    %c0_21 = arith.constant 0 : index
    %15 = arith.index_cast %14 : i32 to index
    %16 = vector.load %arg1[%c0_21, %15] : memref<24x128xf32, #tpu.memory_space<vmem>>, vector<24x128xf32>
    %c0_22 = arith.constant 0 : index
    %17 = arith.index_cast %14 : i32 to index
    %18 = vector.load %arg2[%c0_22, %17] : memref<16x128xf32, #tpu.memory_space<vmem>>, vector<16x128xf32>
    %cst_23 = arith.constant dense<0.000000e+00> : vector<24x128xf32>
    %19 = tpu.matmul %0, %16, %cst_23 {dimension_numbers = #tpu.dot_dimension_numbers<[1], [0], [0], [1], [0, 0, 1, 1], [], []>} : vector<24x24xf32>, vector<24x128xf32>, vector<24x128xf32> -> vector<24x128xf32>
    %20 = vector.broadcast %1 : vector<24x1xf32> to vector<24x128xf32>
    %21 = arith.addf %19, %20 : vector<24x128xf32>
    %cst_24 = arith.constant 0.000000e+00 : f32
    %22 = vector.broadcast %cst_24 : f32 to vector<24x128xf32>
    %23 = arith.maximumf %21, %22 : vector<24x128xf32>
    %24 = vector.extract_strided_slice %23 {offsets = [0, 0], sizes = [8, 128], strides = [1, 1]} : vector<24x128xf32> to vector<8x128xf32>
    %25 = vector.extract_strided_slice %23 {offsets = [8, 0], sizes = [8, 128], strides = [1, 1]} : vector<24x128xf32> to vector<8x128xf32>
    %26 = arith.addf %24, %25 : vector<8x128xf32>
    %27 = vector.extract_strided_slice %23 {offsets = [16, 0], sizes = [8, 128], strides = [1, 1]} : vector<24x128xf32> to vector<8x128xf32>
    %28 = arith.addf %26, %27 : vector<8x128xf32>
    %cst_25 = arith.constant dense<0.000000e+00> : vector<8x128xf32>
    %29 = tpu.matmul %2, %28, %cst_25 {dimension_numbers = #tpu.dot_dimension_numbers<[1], [0], [0], [1], [0, 0, 1, 1], [], []>} : vector<8x8xf32>, vector<8x128xf32>, vector<8x128xf32> -> vector<8x128xf32>
    %30 = vector.broadcast %5 : vector<8x1xf32> to vector<8x128xf32>
    %31 = arith.addf %29, %30 : vector<8x128xf32>
    %cst_26 = arith.constant dense<0.000000e+00> : vector<32x128xf32>
    %32 = tpu.matmul %6, %18, %cst_26 {dimension_numbers = #tpu.dot_dimension_numbers<[1], [0], [0], [1], [0, 0, 1, 1], [], []>} : vector<32x16xf32>, vector<16x128xf32>, vector<32x128xf32> -> vector<32x128xf32>
    %cst_27 = arith.constant dense<0.000000e+00> : vector<32x128xf32>
    %33 = tpu.matmul %7, %31, %cst_27 {dimension_numbers = #tpu.dot_dimension_numbers<[1], [0], [0], [1], [0, 0, 1, 1], [], []>} : vector<32x8xf32>, vector<8x128xf32>, vector<32x128xf32> -> vector<32x128xf32>
    %34 = arith.addf %32, %33 : vector<32x128xf32>
    %35 = vector.broadcast %8 : vector<32x1xf32> to vector<32x128xf32>
    %36 = arith.addf %34, %35 : vector<32x128xf32>
    %cst_28 = arith.constant 0.000000e+00 : f32
    %37 = vector.broadcast %cst_28 : f32 to vector<32x128xf32>
    %38 = arith.maximumf %36, %37 : vector<32x128xf32>
    %cst_29 = arith.constant dense<0.000000e+00> : vector<32x128xf32>
    %39 = tpu.matmul %9, %38, %cst_29 {dimension_numbers = #tpu.dot_dimension_numbers<[1], [0], [0], [1], [0, 0, 1, 1], [], []>} : vector<32x32xf32>, vector<32x128xf32>, vector<32x128xf32> -> vector<32x128xf32>
    %40 = vector.broadcast %10 : vector<32x1xf32> to vector<32x128xf32>
    %41 = arith.addf %39, %40 : vector<32x128xf32>
    %cst_30 = arith.constant 0.000000e+00 : f32
    %42 = vector.broadcast %cst_30 : f32 to vector<32x128xf32>
    %43 = arith.maximumf %41, %42 : vector<32x128xf32>
    %cst_31 = arith.constant dense<0.000000e+00> : vector<1x128xf32>
    %44 = tpu.matmul %11, %43, %cst_31 {dimension_numbers = #tpu.dot_dimension_numbers<[1], [0], [0], [1], [0, 0, 1, 1], [], []>} : vector<1x32xf32>, vector<32x128xf32>, vector<1x128xf32> -> vector<1x128xf32>
    %45 = vector.broadcast %12 : vector<1x1xf32> to vector<1x128xf32>
    %46 = arith.addf %44, %45 : vector<1x128xf32>
    %cst_32 = arith.constant 0.000000e+00 : f32
    %47 = vector.broadcast %cst_32 : f32 to vector<1x128xf32>
    %48 = arith.cmpf ogt, %46, %47 : vector<1x128xf32>
    %49 = math.exp %46 : vector<1x128xf32>
    %cst_33 = arith.constant 1.000000e+00 : f32
    %50 = vector.broadcast %cst_33 : f32 to vector<1x128xf32>
    %51 = arith.subf %49, %50 : vector<1x128xf32>
    %cst_34 = arith.constant 9.99999974E-6 : f32
    %52 = vector.broadcast %cst_34 : f32 to vector<1x128xf32>
    %53 = arith.mulf %52, %51 : vector<1x128xf32>
    %54 = arith.select %48, %46, %53 : vector<1x128xi1>, vector<1x128xf32>
    %cst_35 = arith.constant 0.000000e+00 : f32
    %55 = vector.broadcast %cst_35 : f32 to vector<1x128xf32>
    %56 = arith.subf %55, %54 : vector<1x128xf32>
    %c0_36 = arith.constant 0 : index
    %57 = arith.index_cast %14 : i32 to index
    %58 = vector.load %arg14[%c0_36, %57] : memref<1x128xf32, #tpu.memory_space<vmem>>, vector<1x128xf32>
    tpu.vector_store %arg14[%c0_36, %57], %56 {strides = array<i32>} : memref<1x128xf32, #tpu.memory_space<vmem>>, vector<1x128xf32>,
    %c1_i32 = arith.constant 1 : i32
    return
  }
  func.func @transform_0(%arg0: i32) -> (i32, i32) {
    %c0_i32 = arith.constant 0 : i32
    %c0_i32_0 = arith.constant 0 : i32
    return %c0_i32, %arg0 : i32, i32
  }
  func.func @transform_1(%arg0: i32) -> (i32, i32) {
    %c0_i32 = arith.constant 0 : i32
    %c0_i32_0 = arith.constant 0 : i32
    return %c0_i32, %arg0 : i32, i32
  }
  func.func @transform_2(%arg0: i32) -> (i32, i32) {
    %c0_i32 = arith.constant 0 : i32
    %c0_i32_0 = arith.constant 0 : i32
    %c0_i32_1 = arith.constant 0 : i32
    return %c0_i32, %c0_i32_0 : i32, i32
  }
  func.func @transform_3(%arg0: i32) -> (i32, i32) {
    %c0_i32 = arith.constant 0 : i32
    %c0_i32_0 = arith.constant 0 : i32
    %c0_i32_1 = arith.constant 0 : i32
    return %c0_i32, %c0_i32_0 : i32, i32
  }
  func.func @transform_4(%arg0: i32) -> (i32, i32) {
    %c0_i32 = arith.constant 0 : i32
    %c0_i32_0 = arith.constant 0 : i32
    %c0_i32_1 = arith.constant 0 : i32
    return %c0_i32, %c0_i32_0 : i32, i32
  }
  func.func @transform_5(%arg0: i32) -> (i32, i32) {
    %c0_i32 = arith.constant 0 : i32
    %c0_i32_0 = arith.constant 0 : i32
    %c0_i32_1 = arith.constant 0 : i32
    return %c0_i32, %c0_i32_0 : i32, i32
  }
  func.func @transform_6(%arg0: i32) -> (i32, i32) {
    %c0_i32 = arith.constant 0 : i32
    %c0_i32_0 = arith.constant 0 : i32
    %c0_i32_1 = arith.constant 0 : i32
    return %c0_i32, %c0_i32_0 : i32, i32
  }
  func.func @transform_7(%arg0: i32) -> (i32, i32) {
    %c0_i32 = arith.constant 0 : i32
    %c0_i32_0 = arith.constant 0 : i32
    %c0_i32_1 = arith.constant 0 : i32
    return %c0_i32, %c0_i32_0 : i32, i32
  }
  func.func @transform_8(%arg0: i32) -> (i32, i32) {
    %c0_i32 = arith.constant 0 : i32
    %c0_i32_0 = arith.constant 0 : i32
    %c0_i32_1 = arith.constant 0 : i32
    return %c0_i32, %c0_i32_0 : i32, i32
  }
  func.func @transform_9(%arg0: i32) -> (i32, i32) {
    %c0_i32 = arith.constant 0 : i32
    %c0_i32_0 = arith.constant 0 : i32
    %c0_i32_1 = arith.constant 0 : i32
    return %c0_i32, %c0_i32_0 : i32, i32
  }
  func.func @transform_10(%arg0: i32) -> (i32, i32) {
    %c0_i32 = arith.constant 0 : i32
    %c0_i32_0 = arith.constant 0 : i32
    %c0_i32_1 = arith.constant 0 : i32
    return %c0_i32, %c0_i32_0 : i32, i32
  }
  func.func @transform_11(%arg0: i32) -> (i32, i32) {
    %c0_i32 = arith.constant 0 : i32
    %c0_i32_0 = arith.constant 0 : i32
    %c0_i32_1 = arith.constant 0 : i32
    return %c0_i32, %c0_i32_0 : i32, i32
  }
  func.func @transform_12(%arg0: i32) -> (i32, i32) {
    %c0_i32 = arith.constant 0 : i32
    %c0_i32_0 = arith.constant 0 : i32
    %c0_i32_1 = arith.constant 0 : i32
    return %c0_i32, %c0_i32_0 : i32, i32
  }
  func.func @transform_13(%arg0: i32) -> (i32, i32) {
    %c0_i32 = arith.constant 0 : i32
    %c0_i32_0 = arith.constant 0 : i32
    return %c0_i32, %arg0 : i32, i32
  }
}

</mosaic_0001>

<bundles_post_ra>
// kernel: qtran_qbase2_forward.1
= control target key start
LH: loop header
LB: loop body
LE: loop exit
PB: predicated region body
PF: predicated region fallthrough
CT: control target
= control target key end

     0   :  { %v409_v0 = vmov 0   ;;  %vm97_vm0 = vcmask 195584   ;;  %vm143_vm1 = vcmask 64512   ;;  %vm208_vm2 = vcmask 130048   ;;  %s601_s3 = inlined_call_operand.vmem [shape: f32[24,1], index: 3, kind: input, shape index: {}]   ;;  %s602_s0 = inlined_call_operand.vmem [shape: f32[24,128], index: 0, kind: input, shape index: {}]   ;;  %s603_s12 = inlined_call_operand.<no memory space> [shape: f32[1,1], index: 12, kind: input, shape index: {}]   ;;  %s604_s2 = inlined_call_operand.vmem [shape: f32[24,24], index: 2, kind: input, shape index: {}]   ;;  %s605_s5 = inlined_call_operand.vmem [shape: f32[8,1], index: 5, kind: input, shape index: {}]   ;;  %s606_s8 = inlined_call_operand.vmem [shape: f32[32,1], index: 8, kind: input, shape index: {}]   ;;  %s607_s10 = inlined_call_operand.vmem [shape: f32[32,1], index: 10, kind: input, shape index: {}]   ;;  %s608_s4 = inlined_call_operand.vmem [shape: f32[8,8], index: 4, kind: input, shape index: {}]   ;;  %s609_s1 = inlined_call_operand.vmem [shape: f32[16,128], index: 1, kind: input, shape index: {}]   ;;  %s610_s6 = inlined_call_operand.vmem [shape: f32[32,16], index: 6, kind: input, shape index: {}]   ;;  %s611_s7 = inlined_call_operand.vmem [shape: f32[32,8], index: 7, kind: input, shape index: {}]   ;;  %s612_s9 = inlined_call_operand.vmem [shape: f32[32,32], index: 9, kind: input, shape index: {}]   ;;  %s613_s11 = inlined_call_operand.vmem [shape: f32[1,32], index: 11, kind: input, shape index: {}]   ;;  %s614_s13 = inlined_call_operand.vmem [shape: f32[1,128], index: 13, kind: output, shape index: {}]  }
   0x1   :  { %404 = vset.pattern.permute.xlu0 %v409_v0  ;;  %v49_v1 = vld [vmem:[%s601_s3] sm:$0xff]  ;;  %v79_v2 = vld [vmem:[%s602_s0 + $0x10] sm:$0xff]  ;;  %v78_v3 = vld [vmem:[%s602_s0 + $0x8] sm:$0xff]  ;;  %405 = vset.pattern.permute.xlu1 %v409_v0  ;;  %v18_v4 = vstv %s603_s12  ;;  %vm298_vm3 = vcmask 261120  }
   0x2   :  { %84 = vperm.xlu0 %404, %v49_v1   ;;  %120 = vmatpush.msra.mxu0 %v79_v2  ;;  %v51_v5 = vld [vmem:[%s601_s3 + $0x10] sm:$0xff]  ;;  %19 = vst [vmem:[#allocation2] sm:$0x1] %v18_v4  ;;  %v77_v6 = vld [vmem:[%s602_s0] sm:$0xff]  ;;  %v50_v9 = vld [vmem:[%s601_s3 + $0x8] sm:$0xff] }
   0x3   :  { %94 = vperm.xlu1 %405, %v51_v5   ;;  %406 = vset.pattern.permute.xlu2 %v409_v0  ;;  %v46_v7 = vld [vmem:[%s604_s2] sm:$0xff]  ;;  %v47_v11 = vld [vmem:[%s604_s2 + $0x8] sm:$0xff]  ;;  %v48_v14 = vld [vmem:[%s604_s2 + $0x10] sm:$0xff] }
   0x4   :  { %121 = vmatpush.msra.mxu0 %v78_v3  ;;  %v53_v8 = vld [vmem:[%s605_s5] sm:$0xff]  ;;  %v64_v12 = vld [vmem:[%s606_s8 + $0x8] sm:$0xff]  ;;  %v73_v15 = vld [vmem:[%s607_s10 + $0x10] sm:$0xff] }
   0x5   :  { %v54_v10 = vmul.f32 3.0, %v53_v8  ;;  %v63_v13 = vld [vmem:[%s606_s8] sm:$0xff]  ;;  %v72_v16 = vld [vmem:[%s607_s10 + $0x8] sm:$0xff]  ;;  %v57_v37 = vld [vmem:[%s610_s6 + $0x10] sm:$0xff] }
   0x6   :  { %122 = vmatpush.msra.mxu0 %v77_v6  ;;  %v52_v32 = vld [vmem:[%s608_s4] sm:$0xff]  ;;  %v81_v33 = vld [vmem:[%s609_s1 + $0x8] sm:$0xff]  ;;  %v58_v38 = vld [vmem:[%s610_s6 + $0x18] sm:$0xff] }
   0x7   :  { %385 = vmatmul.msk.f32.vlgmr.msra.gmra.mxu0 %vm97_vm0, %v46_v7  ;;  %235 = vmatpush.msra.mxu3 %v81_v33  ;;  %v80_v34 = vld [vmem:[%s609_s1] sm:$0xff]  ;;  %v56_v36 = vld [vmem:[%s610_s6 + $0x8] sm:$0xff]  ;;  %v66_v39 = vld [vmem:[%s606_s8 + $0x18] sm:$0xff] }
   0x8   :  { %v55_v35 = vld [vmem:[%s610_s6] sm:$0xff]  ;;  %267 = vperm.xlu2 %406, %v66_v39   ;;  %v65_v44 = vld [vmem:[%s606_s8 + $0x10] sm:$0xff]  ;;  %v60_v45 = vld [vmem:[%s611_s7 + $0x8] sm:$0xff] }
   0x9   :  { %v76_v17 = vld [vmem:[#allocation2] sm:$0x1]  ;;  %236 = vmatpush.msra.mxu3 %v80_v34  ;;  %v74_v46 = vld [vmem:[%s607_s10 + $0x18] sm:$0xff]  ;;  %v61_v47 = vld [vmem:[%s611_s7 + $0x10] sm:$0xff] }
   0xa   :  { %89 = vperm.xlu0 %404, %v50_v9   ;;  %393 = vmatmul.msk.f32.vlgmr.msra.gmra.mxu3 %vm208_vm2, %v55_v35  ;;  %v59_v43 = vld [vmem:[%s611_s7] sm:$0xff]  ;;  %v62_v49 = vld [vmem:[%s611_s7 + $0x18] sm:$0xff] }
   0xb   :  { %140 = vperm.xlu1 %405, %v54_v10   ;;  %v71_v48 = vld [vmem:[%s607_s10] sm:$0xff] }
   0xc   :  { %v67_v10 = vld [vmem:[%s612_s9] sm:$0xff] }
   0xf   :  { %386 = vmatmul.msk.f32.gmra.mxu0 %vm97_vm0, %v47_v11  ;;  %v68_v11 = vld [vmem:[%s612_s9 + $0x8] sm:$0xff] }
  0x10   :  { %262 = vperm.xlu2 %406, %v65_v44  }
  0x12   :  { %257 = vperm.xlu0 %404, %v64_v12   ;;  %394 = vmatmul.msk.f32.gmra.mxu3 %vm208_vm2, %v56_v36  ;;  %v69_v12 = vld [vmem:[%s612_s9 + $0x10] sm:$0xff] }
  0x13   :  { %252 = vperm.xlu1 %405, %v63_v13   ;;  %v70_v13 = vld [vmem:[%s612_s9 + $0x18] sm:$0xff] }
  0x17   :  { %387 = vmatmul.msk.f32.gmra.mxu0 %vm97_vm0, %v48_v14 }
  0x18   :  { %295 = vperm.xlu2 %406, %v74_v46  }
  0x1a   :  { %290 = vperm.xlu0 %404, %v73_v15   ;;  %395 = vmatmul.msk.f32.gmra.mxu3 %vm208_vm2, %v57_v37 }
  0x1b   :  { %285 = vperm.xlu1 %405, %v72_v16  }
  0x20   :  { %280 = vperm.xlu2 %406, %v71_v48  }
  0x22   :  { %346 = vperm.xlu0 %404, %v76_v17   ;;  %396 = vmatmul.msk.f32.gmra.mxu3 %vm208_vm2, %v58_v38 }
  0x62   :  { %v268_v55 = vpop.permute.xlu2 %267 }
  0x6a   :  { %v263_v62 = vpop.permute.xlu2 %262 }
  0x72   :  { %v296_v17 = vpop.permute.xlu2 %295 }
  0x74   :  { %v85_v18 = vpop.permute.xlu0 %84 }
  0x75   :  { %v95_v25 = vpop.permute.xlu1 %94 }
  0x7c   :  { %v90_v21 = vpop.permute.xlu0 %89 }
  0x7d   :  { %v141_v40 = vpop.permute.xlu1 %140 }
  0x84   :  { %v124_v19 = vpop.f32.mrf.mxu0  ;;  %v258_v2 = vpop.permute.xlu0 %257 }
  0x85   :  { %v125_v23 = vadd.f32 %v124_v19, %v85_v18  ;;  %v253_v5 = vpop.permute.xlu1 %252 }
  0x87   :  { %v133_v27 = vmax.f32 %v125_v23, 0.0 }
  0x8c   :  { %v127_v20 = vpop.f32.mrf.mxu0  ;;  %v291_v18 = vpop.permute.xlu0 %290 }
  0x8d   :  { %v128_v22 = vadd.f32 %v127_v20, %v90_v21  ;;  %v238_v50 = vpop.f32.mrf.mxu3 }
  0x8f   :  { %v134_v24 = vmax.f32 %v128_v22, 0.0  ;;  %v286_v22 = vpop.permute.xlu1 %285 }
  0x91   :  { %v136_v30 = vadd.f32 %v134_v24, %v133_v27 }
  0x94   :  { %v130_v26 = vpop.f32.mrf.mxu0 }
  0x95   :  { %v131_v28 = vadd.f32 %v130_v26, %v95_v25  ;;  %v241_v52 = vpop.f32.mrf.mxu3  ;;  %v281_v25 = vpop.permute.xlu2 %280 }
  0x97   :  { %v135_v29 = vmax.f32 %v131_v28, 0.0 }
  0x99   :  { %v137_v31 = vadd.f32 %v136_v30, %v135_v29  ;;  %v75_v30 = vld [vmem:[%s613_s11] sm:$0x1] }
  0x9b   :  { %162 = vmatpush.msra.mxu1 %v137_v31  ;;  %v347_v31 = vpop.permute.xlu0 %346 }
  0x9c   :  { %388 = vmatmul.msk.f32.vlgmr.msra.gmra.mxu1 %vm143_vm1, %v52_v32  ;;  %v349_v32 = vperm.slane %v347_v31, 0 }
  0x9d   :  { %v244_v54 = vpop.f32.mrf.mxu3 }
  0xa5   :  { %v247_v57 = vpop.f32.mrf.mxu3 }
 0x119   :  { %v164_v41 = vpop.f32.mrf.mxu1 }
 0x11a   :  { %v165_v42 = vadd.f32 %v164_v41, %v141_v40 }
 0x11c   :  { %194 = vmatpush.msra.mxu2 %v165_v42 }
 0x11d   :  { %389 = vmatmul.msk.f32.vlgmr.msra.gmra.mxu2 %vm143_vm1, %v59_v43 }
 0x125   :  { %390 = vmatmul.msk.f32.gmra.mxu2 %vm143_vm1, %v60_v45 }
 0x12d   :  { %391 = vmatmul.msk.f32.gmra.mxu2 %vm143_vm1, %v61_v47 }
 0x135   :  { %392 = vmatmul.msk.f32.gmra.mxu2 %vm143_vm1, %v62_v49 }
 0x1a0   :  { %v196_v51 = vpop.f32.mrf.mxu2 }
 0x1a1   :  { %v239_v63 = vadd.f32 %v238_v50, %v196_v51 }
 0x1a3   :  { %v270_v7 = vadd.f32 %v253_v5, %v239_v63 }
 0x1a5   :  { %v274_v9 = vmax.f32 %v270_v7, 0.0 }
 0x1a8   :  { %v199_v53 = vpop.f32.mrf.mxu2 }
 0x1a9   :  { %v242_v60 = vadd.f32 %v241_v52, %v199_v53 }
 0x1ab   :  { %v271_v4 = vadd.f32 %v258_v2, %v242_v60 }
 0x1ad   :  { %v275_v8 = vmax.f32 %v271_v4, 0.0 }
 0x1b0   :  { %v202_v56 = vpop.f32.mrf.mxu2 }
 0x1b1   :  { %v245_v58 = vadd.f32 %v244_v54, %v202_v56 }
 0x1b3   :  { %v272_v1 = vadd.f32 %v263_v62, %v245_v58 }
 0x1b5   :  { %v276_v6 = vmax.f32 %v272_v1, 0.0 }
 0x1b8   :  { %v205_v59 = vpop.f32.mrf.mxu2 }
 0x1b9   :  { %v248_v61 = vadd.f32 %v247_v57, %v205_v59 }
 0x1bb   :  { %v273_v0 = vadd.f32 %v268_v55, %v248_v61 }
 0x1bd   :  { %v277_v3 = vmax.f32 %v273_v0, 0.0 }
 0x1bf   :  { %323 = vmatpush.msrb.mxu1 %v277_v3 }
 0x1c1   :  { %324 = vmatpush.msrb.mxu1 %v276_v6 }
 0x1c3   :  { %325 = vmatpush.msrb.mxu1 %v275_v8 }
 0x1c5   :  { %326 = vmatpush.msrb.mxu1 %v274_v9 }
 0x1c6   :  { %397 = vmatmul.msk.f32.vlgmr.msrb.gmra.mxu1 %vm298_vm3, %v67_v10 }
 0x1ce   :  { %398 = vmatmul.msk.f32.gmra.mxu1 %vm298_vm3, %v68_v11 }
 0x1d6   :  { %399 = vmatmul.msk.f32.gmra.mxu1 %vm298_vm3, %v69_v12 }
 0x1de   :  { %400 = vmatmul.msk.f32.gmra.mxu1 %vm298_vm3, %v70_v13 }
 0x243   :  { %v328_v14 = vpop.f32.mrf.mxu1 }
 0x244   :  { %v329_v26 = vadd.f32 %v328_v14, %v281_v25 }
 0x246   :  { %v340_v29 = vmax.f32 %v329_v26, 0.0 }
 0x24b   :  { %v331_v15 = vpop.f32.mrf.mxu1 }
 0x24c   :  { %v332_v23 = vadd.f32 %v331_v15, %v286_v22 }
 0x24e   :  { %v341_v28 = vmax.f32 %v332_v23, 0.0 }
 0x253   :  { %v334_v16 = vpop.f32.mrf.mxu1 }
 0x254   :  { %v335_v20 = vadd.f32 %v334_v16, %v291_v18 }
 0x256   :  { %v342_v27 = vmax.f32 %v335_v20, 0.0 }
 0x25b   :  { %v337_v19 = vpop.f32.mrf.mxu1 }
 0x25c   :  { %v338_v21 = vadd.f32 %v337_v19, %v296_v17 }
 0x25e   :  { %v343_v24 = vmax.f32 %v338_v21, 0.0 }
 0x260   :  { %365 = vmatpush.msrb.mxu0 %v343_v24 }
 0x262   :  { %366 = vmatpush.msrb.mxu0 %v342_v27 }
 0x264   :  { %367 = vmatpush.msrb.mxu0 %v341_v28 }
 0x266   :  { %368 = vmatpush.msrb.mxu0 %v340_v29 }
 0x267   :  { %401 = vmatmul.msk.f32.vlgmr.msrb.gmra.mxu0 %vm298_vm3, %v75_v30 }
 0x2e4   :  { %v370_v33 = vpop.f32.mrf.mxu0 }
 0x2e5   :  { %v371_v34 = vadd.f32 %v370_v33, %v349_v32 }
 0x2e7   :  { %v374_v35 = vmul.f32 1.442695, %v371_v34  ;;  %vm373_vm4 = vcmp.gt.f32.partialorder %v371_v34, 0.0 }
 0x2e9   :  { %407 = vpow2.f32 %v374_v35 }
 0x2ef   :  { %v408_v36 = vpop.eup %407 }
 0x2f0   :  { %v402_v37 = vadd.f32 -1.0, %v408_v36 }
 0x2f2   :  { %v377_v38 = vmul.f32 1e-05, %v402_v37 }
 0x2f4   :  { %v378_v39 = vsel %vm373_vm4, %v371_v34, %v377_v38 }
 0x2f5   :  { %v379_v40 = vsub.f32 0.0, %v378_v39 }
 0x2f7   :  { %380 = vst [vmem:[%s614_s13] sm:$0x1] %v379_v40 }

</bundles_post_ra>
